<compile_context>
chip_gen: v7x
topology: tpu7x:2x2x1
jax: 0.10.0
libtpu: 0.0.40
codegen_flags: <defaults>
</compile_context>

<pallas_src>
import functools

import jax
import jax.numpy as jnp
from jax.experimental import pallas as pl
from jax.experimental.pallas import tpu as pltpu


# ----------------------------------------------------------------------------
# Fused kernel: Coeff_NN MLP (MXU for the hidden matmul) + flux stencil,
# everything in the flat lane-dense [1, N] layout (N = Nx*Ny, row-major).
# ----------------------------------------------------------------------------
def fused_flux_kernel(x_ref, u_ref, w0t_ref, b0_ref, w1t_ref, b1_ref, w2_ref,
                      scal_ref, out_ref, *, nx, ny):
    """
    x_ref    : [F, N]  coupled features, spatial flattened row-major
    u_ref    : [1, N]  main variable, spatial flattened row-major
    w0t_ref  : [H, F]  layer-0 weight (transposed)
    b0_ref   : [H, 1]
    w1t_ref  : [H, H]  hidden-layer weight (transposed)
    b1_ref   : [H, 1]
    w2_ref   : [H, 1]  output-layer weight
    scal_ref : SMEM f32[8] = [b2, fm_scale(=10**p_exp * D_eff), s0, 4*s1,
                              d_left, d_right, d_top, d_bottom]
    out_ref  : [1, N]  integrated flux (flat)
    """
    n = nx * ny
    num_f = x_ref.shape[0]

    b2 = scal_ref[0]
    fm_scale = scal_ref[1]
    s0 = scal_ref[2]
    c_diag = scal_ref[3]          # 4 * s1
    d_left = scal_ref[4]
    d_right = scal_ref[5]
    d_top = scal_ref[6]
    d_bottom = scal_ref[7]

    # ---- Coeff_NN MLP, activations [H, N]: spatial points on the lane axis ----
    x = x_ref[...]                                     # [F, N]
    w0t = w0t_ref[...]                                 # [H, F]
    # Layer 0 (K = F is tiny): VPU broadcast FMAs, no K=2 MXU matmul.
    h = b0_ref[...]                                    # [H, 1]
    for f in range(num_f):                             # static -> unrolled
        h = h + w0t[:, f:f + 1] * x[f:f + 1, :]        # [H,1]*[1,N] -> [H,N]
    h = jnp.tanh(h)
    # Layer 1: the only real matmul -> MXU, lane axis fully used (N >= 128).
    h = jnp.tanh(jnp.dot(w1t_ref[...], h, preferred_element_type=jnp.float32)
                 + b1_ref[...])                        # [H, N]
    # Layer 2 (-> 1 output): VPU multiply + cross-sublane reduce (no N=1 matmul).
    z = jnp.sum(w2_ref[...] * h, axis=0, keepdims=True) + b2        # [1, N]
    fm = jax.nn.sigmoid(z) * fm_scale                  # folds 10**p_exp * D_eff

    # ---- finite-volume stencil in flat layout: lane rolls on [1, N] ----------
    u = u_ref[...]                                     # [1, N]

    # Boundary masks from a lane iota (VPU compares on otherwise-idle lanes).
    idx = jax.lax.broadcasted_iota(jnp.int32, (1, n), 1)
    if (ny & (ny - 1)) == 0:                           # trace-time Python branch
        col = idx & (ny - 1)
    else:
        col = idx % ny   # TODO(synk): non-power-of-2 Ny path (vector remainder)

    # roll(u, s)[k] = u[(k - s) mod N]; the wrapped entries at the physical
    # boundary are replaced by the Dirichlet values BEFORE summing, so the
    # kernel ends in one unmasked lane-dense store (no RMW partial stores).
    u_im1 = jnp.where(idx < ny, d_left, pltpu.roll(u, ny, axis=1))
    u_ip1 = jnp.where(idx >= n - ny, d_right, pltpu.roll(u, n - ny, axis=1))
    u_jm1 = jnp.where(col == 0, d_top, pltpu.roll(u, 1, axis=1))
    u_jp1 = jnp.where(col == ny - 1, d_bottom, pltpu.roll(u, n - 1, axis=1))

    nbr = u_im1 + u_ip1 + u_jm1 + u_jp1
    out_ref[...] = fm * (s0 * nbr + c_diag * u)


def _fused_flux_call(x_flat, u_flat, w0t, b0c, w1t, b1c, w2c, scalars, nx, ny):
    n = nx * ny
    vmem = pl.BlockSpec(memory_space=pltpu.MemorySpace.VMEM)
    smem = pl.BlockSpec(memory_space=pltpu.MemorySpace.SMEM)
    kernel = functools.partial(fused_flux_kernel, nx=nx, ny=ny)
    return pl.pallas_call(
        kernel,
        out_shape=jax.ShapeDtypeStruct((1, n), jnp.float32),
        in_specs=[vmem, vmem, vmem, vmem, vmem, vmem, vmem, smem],
        out_specs=vmem,
    )(x_flat, u_flat, w0t, b0c, w1t, b1c, w2c, scalars)


# ----------------------------------------------------------------------------
# Hoisted glue: orient weights for the [H, N] layout and fold constants. Called
# once per model, NOT per timestep.
# ----------------------------------------------------------------------------
def prepare_params(weights, stencil, d_eff, p_exp, dirichlet_val):
    w0, b0, w1, b1, w2, b2 = weights
    w0t = jnp.asarray(w0, jnp.float32).T                    # [H, F]
    b0c = jnp.asarray(b0, jnp.float32).reshape(-1, 1)       # [H, 1]
    w1t = jnp.asarray(w1, jnp.float32).T                    # [H, H]
    b1c = jnp.asarray(b1, jnp.float32).reshape(-1, 1)       # [H, 1]
    w2c = jnp.asarray(w2, jnp.float32).reshape(-1, 1)       # [H, 1]
    b2s = jnp.asarray(b2, jnp.float32).reshape(())
    st = jnp.asarray(stencil, jnp.float32)
    dv = jnp.asarray(dirichlet_val, jnp.float32)
    fm_scale = (jnp.asarray(10.0, jnp.float32)
                ** jnp.asarray(p_exp, jnp.float32)) * jnp.asarray(d_eff,
                                                                  jnp.float32)
    scalars = jnp.stack([b2s, fm_scale, st[0], 4.0 * st[1],
                         dv[0], dv[1], dv[2], dv[3]]).astype(jnp.float32)
    return w0t, b0c, w1t, b1c, w2c, scalars


# ----------------------------------------------------------------------------
# Per-timestep forward (hot path): free reshapes + one fused pallas_call.
# ----------------------------------------------------------------------------
@jax.jit
def flux_kernels_forward(u_main, u_coupled, params):
    # u_main: [1, Nx, Ny]   u_coupled: [F, Nx, Ny]
    w0t, b0c, w1t, b1c, w2c, scalars = params
    f, nx, ny = u_coupled.shape
    n = nx * ny
    x_flat = u_coupled.reshape(f, n)     # contiguous minor-dim collapse: free
    u_flat = u_main.reshape(1, n)        # contiguous minor-dim collapse: free
    out = _fused_flux_call(x_flat, u_flat, w0t, b0c, w1t, b1c, w2c, scalars,
                           nx, ny)
    return out.reshape(nx, ny)           # free un-collapse


# ----------------------------------------------------------------------------
# Pure-JAX reference (line-by-line mirror of the PyTorch forward)
# ----------------------------------------------------------------------------
def reference_forward(u_main, u_coupled, weights, stencil, d_eff, p_exp,
                      dirichlet_val):
    w0, b0, w1, b1, w2, b2 = weights
    x = jnp.transpose(u_coupled, (1, 2, 0))
    h = jnp.tanh(x @ w0 + b0[0])
    h = jnp.tanh(h @ w1 + b1[0])
    z = jax.nn.sigmoid(h @ w2 + b2[0])
    flux_mult = z[..., 0] * 10.0 ** p_exp

    u = u_main[0]
    s0, s1 = stencil[0], stencil[1]
    d0, d1, d2, d3 = dirichlet_val

    left_bound = ((s0 * d0 + s1 * u[0, :])[None, :] * d_eff * flux_mult[0, :])
    left_nb = (s0 * u[:-1, :] + s1 * u[1:, :]) * d_eff * flux_mult[1:, :]
    left_flux = jnp.concatenate([left_bound, left_nb], axis=0)

    right_bound = ((s0 * d1 + s1 * u[-1, :])[None, :] * d_eff * flux_mult[-1, :])
    right_nb = (s0 * u[1:, :] + s1 * u[:-1, :]) * d_eff * flux_mult[:-1, :]
    right_flux = jnp.concatenate([right_nb, right_bound], axis=0)

    top_bound = ((s0 * d2 + s1 * u[:, 0])[:, None] * d_eff
                 * flux_mult[:, 0][:, None])
    top_nb = (s0 * u[:, :-1] + s1 * u[:, 1:]) * d_eff * flux_mult[:, 1:]
    top_flux = jnp.concatenate([top_bound, top_nb], axis=1)

    bottom_bound = ((s0 * d3 + s1 * u[:, -1])[:, None] * d_eff
                    * flux_mult[:, -1][:, None])
    bottom_nb = (s0 * u[:, 1:] + s1 * u[:, :-1]) * d_eff * flux_mult[:, :-1]
    bottom_flux = jnp.concatenate([bottom_nb, bottom_bound], axis=1)

    return left_flux + right_flux + top_flux + bottom_flux


if __name__ == "__main__":
    NX, NY = 16, 16          # spatial grid
    F = 2                    # num coupled features (len(flux_couple_idx))
    H = 32                   # num_nodes_flux
    # num_layers_flux = 2 -> Linear(F,H)+Tanh, Linear(H,H)+Tanh, Linear(H,1)+Sigmoid

    key = jax.random.PRNGKey(0)
    k = jax.random.split(key, 9)
    u_main = jax.random.uniform(k[0], (1, NX, NY), dtype=jnp.float32)
    u_coupled = jax.random.uniform(k[1], (F, NX, NY), dtype=jnp.float32)

    # deterministic Coeff_NN parameters (PyTorch orientation: x @ W + b)
    w0 = jax.random.normal(k[2], (F, H), dtype=jnp.float32) * 0.5
    b0 = jax.random.normal(k[3], (1, H), dtype=jnp.float32) * 0.1
    w1 = jax.random.normal(k[4], (H, H), dtype=jnp.float32) * 0.2
    b1 = jax.random.normal(k[5], (1, H), dtype=jnp.float32) * 0.1
    w2 = jax.random.normal(k[6], (H, 1), dtype=jnp.float32) * 0.3
    b2 = jax.random.normal(k[7], (1, 1), dtype=jnp.float32) * 0.1
    weights = (w0, b0, w1, b1, w2, b2)

    stencil = jnp.asarray([1.0, -1.0], dtype=jnp.float32)
    d_eff = 0.05
    p_exp = -1.0
    dirichlet_val = jnp.asarray([1.0, 0.5, 0.25, 0.75], dtype=jnp.float32)

    # one-time parameter preparation (hoisted out of the timestep loop)
    params = prepare_params(weights, stencil, d_eff, p_exp, dirichlet_val)
    params = jax.tree_util.tree_map(jax.block_until_ready, params)

    flux = flux_kernels_forward(u_main, u_coupled, params)
    flux = jax.block_until_ready(flux)

    ref = reference_forward(u_main, u_coupled, weights, stencil, d_eff, p_exp,
                            dirichlet_val)
    assert flux.shape == (NX, NY)
    assert jnp.allclose(flux, ref, atol=1e-5, rtol=1e-4), (
        "mismatch vs reference, max abs err = "
        f"{float(jnp.max(jnp.abs(flux - ref)))}")

    print("KERNEL_OK")
</pallas_src>

<mosaic_0001>
module attributes {stable_mosaic.version = 11 : i64} {
  func.func @fused_flux_kernel(%arg0: memref<2x256xf32, #tpu.memory_space<vmem>>, %arg1: memref<1x256xf32, #tpu.memory_space<vmem>>, %arg2: memref<32x2xf32, #tpu.memory_space<vmem>>, %arg3: memref<32x1xf32, #tpu.memory_space<vmem>>, %arg4: memref<32x32xf32, #tpu.memory_space<vmem>>, %arg5: memref<32x1xf32, #tpu.memory_space<vmem>>, %arg6: memref<32x1xf32, #tpu.memory_space<vmem>>, %arg7: memref<8xf32, #tpu.memory_space<smem>>, %arg8: memref<1x256xf32, #tpu.memory_space<vmem>>) attributes {dimension_semantics = [], scalar_prefetch = 0 : i64, scratch_operands = 0 : i64, tpu.core_type = #tpu.core_type<tc>} {
    %c0 = arith.constant 0 : index
    %0 = memref.load %arg7[%c0] : memref<8xf32, #tpu.memory_space<smem>>
    %c1 = arith.constant 1 : index
    %1 = memref.load %arg7[%c1] : memref<8xf32, #tpu.memory_space<smem>>
    %c2 = arith.constant 2 : index
    %2 = memref.load %arg7[%c2] : memref<8xf32, #tpu.memory_space<smem>>
    %c3 = arith.constant 3 : index
    %3 = memref.load %arg7[%c3] : memref<8xf32, #tpu.memory_space<smem>>
    %c4 = arith.constant 4 : index
    %4 = memref.load %arg7[%c4] : memref<8xf32, #tpu.memory_space<smem>>
    %c5 = arith.constant 5 : index
    %5 = memref.load %arg7[%c5] : memref<8xf32, #tpu.memory_space<smem>>
    %c6 = arith.constant 6 : index
    %6 = memref.load %arg7[%c6] : memref<8xf32, #tpu.memory_space<smem>>
    %c7 = arith.constant 7 : index
    %7 = memref.load %arg7[%c7] : memref<8xf32, #tpu.memory_space<smem>>
    %c0_0 = arith.constant 0 : index
    %c0_1 = arith.constant 0 : index
    %8 = vector.load %arg0[%c0_0, %c0_1] : memref<2x256xf32, #tpu.memory_space<vmem>>, vector<2x256xf32>
    %c0_2 = arith.constant 0 : index
    %c0_3 = arith.constant 0 : index
    %9 = vector.load %arg2[%c0_2, %c0_3] : memref<32x2xf32, #tpu.memory_space<vmem>>, vector<32x2xf32>
    %c0_4 = arith.constant 0 : index
    %c0_5 = arith.constant 0 : index
    %10 = vector.load %arg3[%c0_4, %c0_5] : memref<32x1xf32, #tpu.memory_space<vmem>>, vector<32x1xf32>
    %11 = vector.extract_strided_slice %9 {offsets = [0, 0], sizes = [32, 1], strides = [1, 1]} : vector<32x2xf32> to vector<32x1xf32>
    %12 = vector.extract_strided_slice %8 {offsets = [0, 0], sizes = [1, 256], strides = [1, 1]} : vector<2x256xf32> to vector<1x256xf32>
    %13 = vector.broadcast %11 : vector<32x1xf32> to vector<32x256xf32>
    %14 = vector.broadcast %12 : vector<1x256xf32> to vector<32x256xf32>
    %15 = arith.mulf %13, %14 : vector<32x256xf32>
    %16 = vector.broadcast %10 : vector<32x1xf32> to vector<32x256xf32>
    %17 = arith.addf %16, %15 : vector<32x256xf32>
    %18 = vector.extract_strided_slice %9 {offsets = [0, 1], sizes = [32, 1], strides = [1, 1]} : vector<32x2xf32> to vector<32x1xf32>
    %19 = vector.extract_strided_slice %8 {offsets = [1, 0], sizes = [1, 256], strides = [1, 1]} : vector<2x256xf32> to vector<1x256xf32>
    %20 = vector.broadcast %18 : vector<32x1xf32> to vector<32x256xf32>
    %21 = vector.broadcast %19 : vector<1x256xf32> to vector<32x256xf32>
    %22 = arith.mulf %20, %21 : vector<32x256xf32>
    %23 = arith.addf %17, %22 : vector<32x256xf32>
    %24 = math.tanh %23 : vector<32x256xf32>
    %c0_6 = arith.constant 0 : index
    %c0_7 = arith.constant 0 : index
    %25 = vector.load %arg4[%c0_6, %c0_7] : memref<32x32xf32, #tpu.memory_space<vmem>>, vector<32x32xf32>
    %cst = arith.constant dense<0.000000e+00> : vector<32x256xf32>
    %26 = tpu.matmul %25, %24, %cst {dimension_numbers = #tpu.dot_dimension_numbers<[1], [0], [0], [1], [0, 0, 1, 1], [], []>} : vector<32x32xf32>, vector<32x256xf32>, vector<32x256xf32> -> vector<32x256xf32>
    %c0_8 = arith.constant 0 : index
    %c0_9 = arith.constant 0 : index
    %27 = vector.load %arg5[%c0_8, %c0_9] : memref<32x1xf32, #tpu.memory_space<vmem>>, vector<32x1xf32>
    %28 = vector.broadcast %27 : vector<32x1xf32> to vector<32x256xf32>
    %29 = arith.addf %26, %28 : vector<32x256xf32>
    %30 = math.tanh %29 : vector<32x256xf32>
    %c0_10 = arith.constant 0 : index
    %c0_11 = arith.constant 0 : index
    %31 = vector.load %arg6[%c0_10, %c0_11] : memref<32x1xf32, #tpu.memory_space<vmem>>, vector<32x1xf32>
    %32 = vector.broadcast %31 : vector<32x1xf32> to vector<32x256xf32>
    %33 = arith.mulf %32, %30 : vector<32x256xf32>
    %cst_12 = arith.constant dense<0.000000e+00> : vector<256xf32>
    %34 = vector.multi_reduction <add>, %33, %cst_12 [0] : vector<32x256xf32> to vector<256xf32>
    %35 = vector.shape_cast %34 : vector<256xf32> to vector<1x256xf32>
    %36 = vector.broadcast %0 : f32 to vector<1x256xf32>
    %37 = arith.addf %35, %36 : vector<1x256xf32>
    %38 = arith.negf %37 : vector<1x256xf32>
    %39 = math.exp %38 : vector<1x256xf32>
    %cst_13 = arith.constant 1.000000e+00 : f32
    %40 = vector.broadcast %cst_13 : f32 to vector<1x256xf32>
    %41 = arith.addf %40, %39 : vector<1x256xf32>
    %42 = arith.divf %40, %41 : vector<1x256xf32>
    %43 = vector.broadcast %1 : f32 to vector<1x256xf32>
    %44 = arith.mulf %42, %43 : vector<1x256xf32>
    %c0_14 = arith.constant 0 : index
    %c0_15 = arith.constant 0 : index
    %45 = vector.load %arg1[%c0_14, %c0_15] : memref<1x256xf32, #tpu.memory_space<vmem>>, vector<1x256xf32>
    %46 = tpu.iota {dimensions = array<i32: 1>} : vector<1x256xi32>
    %c15_i32 = arith.constant 15 : i32
    %47 = vector.broadcast %c15_i32 : i32 to vector<1x256xi32>
    %48 = arith.andi %46, %47 : vector<1x256xi32>
    %c16_i32 = arith.constant 16 : i32
    %49 = vector.broadcast %c16_i32 : i32 to vector<1x256xi32>
    %50 = arith.cmpi slt, %46, %49 : vector<1x256xi32>
    %c16_i32_16 = arith.constant 16 : i32
    %51 = tpu.dynamic_rotate %45 by %c16_i32_16 dim 1 : vector<1x256xf32>, i32 -> vector<1x256xf32>
    %52 = vector.broadcast %4 : f32 to vector<1x256xf32>
    %53 = arith.select %50, %52, %51 : vector<1x256xi1>, vector<1x256xf32>
    %c240_i32 = arith.constant 240 : i32
    %54 = vector.broadcast %c240_i32 : i32 to vector<1x256xi32>
    %55 = arith.cmpi sge, %46, %54 : vector<1x256xi32>
    %c240_i32_17 = arith.constant 240 : i32
    %56 = tpu.dynamic_rotate %45 by %c240_i32_17 dim 1 : vector<1x256xf32>, i32 -> vector<1x256xf32>
    %57 = vector.broadcast %5 : f32 to vector<1x256xf32>
    %58 = arith.select %55, %57, %56 : vector<1x256xi1>, vector<1x256xf32>
    %c0_i32 = arith.constant 0 : i32
    %59 = vector.broadcast %c0_i32 : i32 to vector<1x256xi32>
    %60 = arith.cmpi eq, %48, %59 : vector<1x256xi32>
    %c1_i32 = arith.constant 1 : i32
    %61 = tpu.dynamic_rotate %45 by %c1_i32 dim 1 : vector<1x256xf32>, i32 -> vector<1x256xf32>
    %62 = vector.broadcast %6 : f32 to vector<1x256xf32>
    %63 = arith.select %60, %62, %61 : vector<1x256xi1>, vector<1x256xf32>
    %c15_i32_18 = arith.constant 15 : i32
    %64 = vector.broadcast %c15_i32_18 : i32 to vector<1x256xi32>
    %65 = arith.cmpi eq, %48, %64 : vector<1x256xi32>
    %c255_i32 = arith.constant 255 : i32
    %66 = tpu.dynamic_rotate %45 by %c255_i32 dim 1 : vector<1x256xf32>, i32 -> vector<1x256xf32>
    %67 = vector.broadcast %7 : f32 to vector<1x256xf32>
    %68 = arith.select %65, %67, %66 : vector<1x256xi1>, vector<1x256xf32>
    %69 = arith.addf %53, %58 : vector<1x256xf32>
    %70 = arith.addf %69, %63 : vector<1x256xf32>
    %71 = arith.addf %70, %68 : vector<1x256xf32>
    %72 = vector.broadcast %2 : f32 to vector<1x256xf32>
    %73 = arith.mulf %72, %71 : vector<1x256xf32>
    %74 = vector.broadcast %3 : f32 to vector<1x256xf32>
    %75 = arith.mulf %74, %45 : vector<1x256xf32>
    %76 = arith.addf %73, %75 : vector<1x256xf32>
    %77 = arith.mulf %44, %76 : vector<1x256xf32>
    %c0_19 = arith.constant 0 : index
    %c0_20 = arith.constant 0 : index
    %78 = vector.load %arg8[%c0_19, %c0_20] : memref<1x256xf32, #tpu.memory_space<vmem>>, vector<1x256xf32>
    tpu.vector_store %arg8[%c0_19, %c0_20], %77 {strides = array<i32>} : memref<1x256xf32, #tpu.memory_space<vmem>>, vector<1x256xf32>,
    return
  }
}

</mosaic_0001>

<bundles_post_ra>
// kernel: flux_kernels_forward.1
= control target key start
LH: loop header
LB: loop body
LE: loop exit
PB: predicated region body
PF: predicated region fallthrough
CT: control target
= control target key end

     0   :  { %13 = vsyncpa [#allocation3], 0  ;;  %s787_s0 = inlined_call_operand.vmem [shape: f32[2,256], index: 0, kind: input, shape index: {}]   ;;  %s788_s1 = inlined_call_operand.vmem [shape: f32[1,256], index: 1, kind: input, shape index: {}]   ;;  %s789_s2 = inlined_call_operand.vmem [shape: f32[32,2], index: 2, kind: input, shape index: {}]   ;;  %s790_s3 = inlined_call_operand.vmem [shape: f32[32,1], index: 3, kind: input, shape index: {}]   ;;  %s791_s4 = inlined_call_operand.vmem [shape: f32[32,32], index: 4, kind: input, shape index: {}]   ;;  %s792_s5 = inlined_call_operand.vmem [shape: f32[32,1], index: 5, kind: input, shape index: {}]   ;;  %s793_s6 = inlined_call_operand.vmem [shape: f32[32,1], index: 6, kind: input, shape index: {}]   ;;  %s794_s7 = inlined_call_operand.vmem [shape: f32[8], index: 7, kind: input, shape index: {}]   ;;  %s795_s8 = inlined_call_operand.vmem [shape: f32[1,256], index: 8, kind: output, shape index: {}]  }
   0x1   :  { %s34_s29 = sshll.u32 %s794_s7, 4  ;;  %s35_s29 = int_to_ptr.vmem [resolvable:$true] %s34_s29 }
   0x2   :  { %s598_s30 = scalar_lea.vmem %s35_s29, 16  ;;  %p603_p1 = scmp.lt.s32.totalorder %s35_s29, %s35_s29 }
   0x3   :  { %p599_p0 = scmp.ne.s32.totalorder %s35_s29, %s598_s30  ;;  %p604_p2 = scmp.lt.s32.totalorder %s598_s30, %s598_s30 }
   0x5   :  { %p605_p3 = por %p604_p2, %p603_p1 }
   0x7   :  { %p606_p4 = pnand %p605_p3, %p599_p0 }
   0x9   :  { %609 = shalt.err (!%p606_p4)
}
   0xa   :  { %s612_s9 = smov [#allocation2]  }
   0xb   :  { %37 = dma.vmem_to_smem %s35_s29, 16, %s612_s9, [#allocation3]  }
   0xc   :  { %610 = dma.done.wait [#allocation3], 16  }
   0xd   :  { %611 = vsyncadd [#allocation3], 4294967280 }
   0xe   :  { %41 = sfence }
   0xf   :  { %v55_v0 = vld [vmem:[%s790_s3] sm:$0xff]  ;;  %v613_v2 = vmov 0   ;;  %v56_v3 = vld [vmem:[%s790_s3 + $0x8] sm:$0xff]  ;;  %v54_v5 = vld [vmem:[%s789_s2 + $0x18] sm:$0xff]  ;;  %v614_v6 = vmov 1   ;;  %v615_v10 = vmov 0.0   ;;  %v80_v11 = vlaneseq }
  0x10   :  { %v51_v1 = vld [vmem:[%s789_s2] sm:$0xff]  ;;  %551 = vset.pattern.permute.xlu1 %v613_v2  ;;  %550 = vset.pattern.permute.xlu0 %v613_v2  ;;  %v52_v4 = vld [vmem:[%s789_s2 + $0x8] sm:$0xff]  ;;  %v53_v7 = vld [vmem:[%s789_s2 + $0x10] sm:$0xff]  ;;  %s616_s17 = smov 16   ;;  %s618_s18 = smov 1   ;;  %vm220_vm0 = vcmask 261120  }
  0x11   :  { %108 = vperm.xlu1 %551, %v55_v0   ;;  %61 = vperm.xlu0 %550, %v51_v1   ;;  %v57_v8 = vld [vmem:[%s790_s3 + $0x10] sm:$0xff]  ;;  %v58_v9 = vld [vmem:[%s790_s3 + $0x18] sm:$0xff]  ;;  %v196_v12 = vld [vmem:[%s792_s5] sm:$0xff]  ;;  %v708_v16 = vshrl.u32 %v80_v11, 7  ;;  %s619_s19 = smov 127   ;;  %s519_s27 = sld [smem:[#allocation2 + $0x4]] }
  0x12   :  { %297 = vmatprep.mubr.f32.mxu0 %v615_v10  ;;  %309 = vmatprep.mubr.f32.mxu1 %v615_v10  ;;  %v197_v13 = vld [vmem:[%s792_s5 + $0x8] sm:$0xff]  ;;  %v198_v14 = vld [vmem:[%s792_s5 + $0x10] sm:$0xff]  ;;  %v330_v15 = vld [vmem:[%s793_s6] sm:$0xff]  ;;  %s520_s3 = sld [smem:[#allocation2 + $0x5]]  ;;  %s763_s28 = sld [smem:[#allocation2 + $0x6]]  ;;  %vm508_vm10 = vcmp.lt.s32.totalorder %v80_v11, 256 }
  0x13   :  { %v199_v17 = vld [vmem:[%s792_s5 + $0x18] sm:$0xff]  ;;  %v332_v18 = vld [vmem:[%s793_s6 + $0x10] sm:$0xff]  ;;  %v719_v19 = vld [vmem:[%s788_s1] sm:$0x3]  ;;  %v722_v20 = vsub.s32 0, %v708_v16  ;;  %v733_v24 = vsub.s32 1, %v708_v16 }
  0x14   :  { %v331_v21 = vld [vmem:[%s793_s6 + $0x8] sm:$0xff]  ;;  %v333_v23 = vld [vmem:[%s793_s6 + $0x18] sm:$0xff]  ;;  %s617_s1 = smov 112   ;;  %v86_v26 = vsub.s32 2, %v708_v16  ;;  %v50_v27 = vld [vmem:[%s787_s0] sm:$0xf] }
  0x15   :  { %113 = vperm.xlu1 %551, %v56_v3   ;;  %66 = vperm.xlu0 %550, %v52_v4   ;;  %v410_v22 = vrot.slane %v719_v19, %v722_v20  ;;  %v414_v25 = vrot.slane %v719_v19, %v733_v24  ;;  %v156_v28 = vsub.s32 3, %v708_v16  ;;  %v83_v31 = vrot.slane %v50_v27, %v722_v20  ;;  %s766_s29 = sld [smem:[#allocation2 + $0x7]]  ;;  %s768_s30 = sld [smem:[#allocation2 + $0x3]] }
  0x16   :  { %v87_v32 = vrot.slane %v50_v27, %v86_v26  ;;  %v153_v33 = vrot.slane %v50_v27, %v733_v24  ;;  %s517_s9 = sld [smem:[#allocation2 + $0x2]]  ;;  %s516_s10 = sld [smem:[#allocation2 + $0x1]] }
  0x17   :  { %v157_v34 = vrot.slane %v50_v27, %v156_v28  ;;  %v93_v35 = vrot.slane %v83_v31, %v722_v20 }
  0x18   :  { %v97_v38 = vrot.slane %v87_v32, %v722_v20  ;;  %v163_v40 = vrot.slane %v153_v33, %v733_v24 }
  0x19   :  { %552 = vset.pattern.permute.xlu1 %v614_v6  ;;  %76 = vperm.xlu0 %550, %v54_v5   ;;  %v167_v41 = vrot.slane %v157_v34, %v733_v24 }
  0x1a   :  { %139 = vperm.xlu1 %552, %v52_v4  }
  0x1d   :  { %554 = vset.pattern.permute.xlu0 %v614_v6 }
  0x1e   :  { %553 = vset.pattern.permute.xlu1 %v613_v2  ;;  %135 = vperm.xlu0 %554, %v51_v1  }
  0x1f   :  { %71 = vperm.xlu1 %553, %v53_v7  }
  0x22   :  { %143 = vperm.xlu0 %554, %v53_v7  }
  0x23   :  { %118 = vperm.xlu1 %553, %v57_v8  }
  0x26   :  { %557 = vset.pattern.permute.xlu0 %v613_v2 }
  0x27   :  { %123 = vperm.xlu1 %553, %v58_v9   ;;  %207 = vperm.xlu0 %557, %v197_v13  }
  0x2b   :  { %555 = vset.pattern.permute.xlu1 %v614_v6  ;;  %336 = vperm.xlu0 %557, %v330_v15  }
  0x2c   :  { %147 = vperm.xlu1 %555, %v54_v5  }
  0x2f   :  { %346 = vperm.xlu0 %557, %v332_v18  }
  0x30   :  { %556 = vset.pattern.permute.xlu1 %v613_v2 }
  0x31   :  { %202 = vperm.xlu1 %556, %v196_v12  }
  0x33   :  { %417 = vrot.lane.b32.xlu0 %v410_v22, %s616_s17 }
  0x35   :  { %212 = vperm.xlu1 %556, %v198_v14  }
  0x37   :  { %428 = vrot.lane.b32.xlu0 %v410_v22, %s617_s1 }
  0x39   :  { %217 = vperm.xlu1 %556, %v199_v17  }
  0x3b   :  { %440 = vrot.lane.b32.xlu0 %v410_v22, %s618_s18 }
  0x3d   :  { %341 = vperm.xlu1 %556, %v331_v21  }
  0x3f   :  { %452 = vrot.lane.b32.xlu0 %v410_v22, %s619_s19 }
  0x41   :  { %351 = vperm.xlu1 %556, %v333_v23  }
  0x45   :  { %419 = vrot.lane.b32.xlu1 %v414_v25, %s616_s17 }
  0x49   :  { %430 = vrot.lane.b32.xlu1 %v414_v25, %s617_s1 }
  0x4d   :  { %442 = vrot.lane.b32.xlu1 %v414_v25, %s618_s18 }
  0x51   :  { %454 = vrot.lane.b32.xlu1 %v414_v25, %s619_s19 }
  0x90   :  { %v109_v29 = vpop.permute.xlu1 %108  ;;  %v62_v30 = vpop.permute.xlu0 %61 }
  0x91   :  { %v98_v44 = vmul.f32 %v93_v35, %v62_v30  ;;  %v99_v46 = vmul.f32 %v97_v38, %v62_v30 }
  0x93   :  { %v126_v54 = vadd.f32 %v109_v29, %v98_v44  ;;  %v127_v55 = vadd.f32 %v109_v29, %v99_v46 }
  0x94   :  { %v114_v36 = vpop.permute.xlu1 %113  ;;  %v67_v37 = vpop.permute.xlu0 %66 }
  0x95   :  { %v100_v39 = vmul.f32 %v93_v35, %v67_v37  ;;  %v101_v42 = vmul.f32 %v97_v38, %v67_v37  ;;  %v193_v37 = vld [vmem:[%s791_s4 + $0x8] sm:$0xff] }
  0x97   :  { %v128_v47 = vadd.f32 %v114_v36, %v100_v39  ;;  %v129_v50 = vadd.f32 %v114_v36, %v101_v42  ;;  %v194_v36 = vld [vmem:[%s791_s4 + $0x10] sm:$0xff] }
  0x98   :  { %v77_v43 = vpop.permute.xlu0 %76 }
  0x99   :  { %v140_v45 = vpop.permute.xlu1 %139  ;;  %v104_v7 = vmul.f32 %v93_v35, %v77_v43  ;;  %v105_v8 = vmul.f32 %v97_v38, %v77_v43 }
  0x9a   :  { %v170_v48 = vmul.f32 %v163_v40, %v140_v45  ;;  %v171_v49 = vmul.f32 %v167_v41, %v140_v45 }
  0x9c   :  { %v178_v51 = vadd.f32 %v170_v48, %v128_v47  ;;  %v179_v52 = vadd.f32 %v171_v49, %v129_v50 }
  0x9d   :  { %v136_v53 = vpop.permute.xlu0 %135 }
  0x9e   :  { %v168_v56 = vmul.f32 %v163_v40, %v136_v53  ;;  %v169_v57 = vmul.f32 %v167_v41, %v136_v53  ;;  %v72_v58 = vpop.permute.xlu1 %71  ;;  %558 = vtanh.f32 %v178_v51 }
  0x9f   :  { %560 = vtanh.f32 %v179_v52  ;;  %v102_v63 = vmul.f32 %v93_v35, %v72_v58  ;;  %v103_v0 = vmul.f32 %v97_v38, %v72_v58  ;;  %v192_v35 = vld [vmem:[%s791_s4] sm:$0xff]  ;;  %v195_v38 = vld [vmem:[%s791_s4 + $0x18] sm:$0xff]  ;;  %s42_s4 = sld [smem:[#allocation2]] }
  0xa0   :  { %v176_v59 = vadd.f32 %v168_v56, %v126_v54  ;;  %v177_v60 = vadd.f32 %v169_v57, %v127_v55 }
  0xa1   :  { %v144_v62 = vpop.permute.xlu0 %143 }
  0xa2   :  { %562 = vtanh.f32 %v176_v59  ;;  %v119_v61 = vpop.permute.xlu1 %118  ;;  %v172_v2 = vmul.f32 %v163_v40, %v144_v62  ;;  %v173_v5 = vmul.f32 %v167_v41, %v144_v62 }
  0xa3   :  { %564 = vtanh.f32 %v177_v60  ;;  %v130_v1 = vadd.f32 %v119_v61, %v102_v63  ;;  %v131_v4 = vadd.f32 %v119_v61, %v103_v0 }
  0xa5   :  { %v180_v9 = vadd.f32 %v172_v2, %v130_v1  ;;  %v181_v13 = vadd.f32 %v173_v5, %v131_v4 }
  0xa6   :  { %v124_v3 = vpop.permute.xlu1 %123  ;;  %v208_v49 = vpop.permute.xlu0 %207 }
  0xa7   :  { %v132_v17 = vadd.f32 %v124_v3, %v104_v7  ;;  %v133_v18 = vadd.f32 %v124_v3, %v105_v8  ;;  %566 = vtanh.f32 %v180_v9 }
  0xa8   :  { %v559_v6 = vpop.eup %558  ;;  %568 = vtanh.f32 %v181_v13 }
  0xa9   :  { %v561_v12 = vpop.eup %560 }
  0xaa   :  { %v337_v59 = vpop.permute.xlu0 %336 }
  0xab   :  { %v148_v14 = vpop.permute.xlu1 %147 }
  0xac   :  { %v563_v15 = vpop.eup %562  ;;  %v174_v21 = vmul.f32 %v163_v40, %v148_v14  ;;  %v175_v22 = vmul.f32 %v167_v41, %v148_v14 }
  0xad   :  { %v565_v23 = vpop.eup %564  ;;  %v531_v25 = vpack.c.bf16 %v559_v6, %v563_v15 }
  0xae   :  { %v182_v26 = vadd.f32 %v174_v21, %v132_v17  ;;  %v183_v27 = vadd.f32 %v175_v22, %v133_v18  ;;  %v529_v28 = vpack.c.bf16 %v561_v12, %v565_v23  ;;  %v347_v5 = vpop.permute.xlu0 %346 }
  0xb0   :  { %570 = vtanh.f32 %v182_v26  ;;  %530 = vmatprep.subr.bf16.mxu0 %v529_v28  ;;  %537 = vmatprep.subr.bf16.mxu1 %v529_v28  ;;  %v203_v39 = vpop.permute.xlu1 %202 }
  0xb1   :  { %572 = vtanh.f32 %v183_v27  ;;  %532 = vmatpush1.bf16.msra.mxu0 %v531_v25  ;;  %539 = vmatpush1.bf16.msra.mxu1 %v531_v25  ;;  %v567_v29 = vpop.eup %566 }
  0xb2   :  { %v569_v30 = vpop.eup %568 }
  0xb4   :  { %v213_v40 = vpop.permute.xlu1 %212 }
  0xb8   :  { %v218_v48 = vpop.permute.xlu1 %217 }
  0xba   :  { %v571_v31 = vpop.eup %570 }
  0xbb   :  { %v573_v32 = vpop.eup %572  ;;  %v535_v33 = vpack.c.bf16 %v571_v31, %v567_v29 }
  0xbc   :  { %v533_v34 = vpack.c.bf16 %v573_v32, %v569_v30  ;;  %v342_v62 = vpop.permute.xlu1 %341  ;;  %v418_v32 = vpop.permute.xlu0 %417 }
  0xbe   :  { %534 = vmatprep.subr.bf16.mxu0 %v533_v34  ;;  %538 = vmatprep.subr.bf16.mxu1 %v533_v34 }
  0xbf   :  { %536 = vmatpush1.bf16.msra.mxu0 %v535_v33  ;;  %540 = vmatpush1.bf16.msra.mxu1 %v535_v33 }
  0xc0   :  { %v352_v13 = vpop.permute.xlu1 %351 }
  0xc2   :  { %523 = vmatmul.mubr.msk.f32.vlgmr.msra.gmra.mrb[0].mxu0 %vm220_vm0, %v192_v35  ;;  %525 = vmatmul.mubr.msk.f32.vlgmr.msra.gmra.mrb[0].mxu1 %vm220_vm0, %v194_v36 }
  0xc3   :  { %303 = vmatprep.mubr.f32.mxu0 %v615_v10  ;;  %315 = vmatprep.mubr.f32.mxu1 %v615_v10 }
  0xc4   :  { %v420_v31 = vpop.permute.xlu1 %419 }
  0xc6   :  { %524 = vmatmul.mubr.msk.f32.gmra.mrb[2].mxu0 %vm220_vm0, %v193_v37  ;;  %526 = vmatmul.mubr.msk.f32.gmra.mrb[2].mxu1 %vm220_vm0, %v195_v38  ;;  %v380_v37 = vstv %s42_s4 }
 0x195   :  { %v299_v41 = vpop.f32.mrb[0].mxu0  ;;  %v311_v42 = vpop.f32.mrb[0].mxu1 }
 0x196   :  { %v300_v43 = vadd.f32 %v299_v41, %v203_v39  ;;  %v312_v44 = vadd.f32 %v311_v42, %v213_v40  ;;  %v301_v45 = vpop.f32.mrb[1].mxu0  ;;  %v313_v46 = vpop.f32.mrb[1].mxu1 }
 0x197   :  { %v302_v47 = vadd.f32 %v301_v45, %v203_v39  ;;  %v314_v10 = vadd.f32 %v313_v46, %v213_v40  ;;  %v431_v40 = vpop.permute.xlu1 %430  ;;  %v429_v41 = vpop.permute.xlu0 %428 }
 0x198   :  { %574 = vtanh.f32 %v300_v43 }
 0x199   :  { %576 = vtanh.f32 %v312_v44  ;;  %v305_v50 = vpop.f32.mrb[2].mxu0  ;;  %v317_v51 = vpop.f32.mrb[2].mxu1  ;;  %v400_v44 = vand.u32 127, %v80_v11 }
 0x19a   :  { %578 = vtanh.f32 %v302_v47  ;;  %v306_v52 = vadd.f32 %v305_v50, %v208_v49  ;;  %v318_v53 = vadd.f32 %v317_v51, %v218_v48  ;;  %v307_v54 = vpop.f32.mrb[3].mxu0  ;;  %v319_v55 = vpop.f32.mrb[3].mxu1  ;;  %v423_v51 = vstv %s519_s27 }
 0x19b   :  { %580 = vtanh.f32 %v314_v10  ;;  %v308_v56 = vadd.f32 %v307_v54, %v208_v49  ;;  %v320_v57 = vadd.f32 %v319_v55, %v218_v48  ;;  %vm404_vm1 = vcmp.lt.s32.totalorder %v400_v44, 16  ;;  %v443_v48 = vpop.permute.xlu1 %442  ;;  %v441_v49 = vpop.permute.xlu0 %440 }
 0x19c   :  { %582 = vtanh.f32 %v306_v52  ;;  %v401_v10 = vadd.s32 128, %v400_v44  ;;  %vm432_vm2 = vcmp.lt.s32.totalorder %v400_v44, 112  ;;  %v422_v50 = vsel %vm404_vm1, %v420_v31, %v418_v32 }
 0x19d   :  { %584 = vtanh.f32 %v318_v53  ;;  %v402_v52 = vand.u32 15, %v400_v44  ;;  %vm444_vm3 = vcmp.lt.s32.totalorder %v400_v44, 1  ;;  %v434_v53 = vsel %vm432_vm2, %v431_v40, %v429_v41 }
 0x19e   :  { %586 = vtanh.f32 %v308_v56  ;;  %vm427_vm4 = vcmp.ge.s32.totalorder %v401_v10, 240  ;;  %v435_v54 = vstv %s520_s3  ;;  %v403_v55 = vand.u32 15, %v401_v10 }
 0x19f   :  { %588 = vtanh.f32 %v320_v57  ;;  %v424_v56 = vsel %vm404_vm1, %v423_v51, %v422_v50  ;;  %v433_v57 = vsel %vm432_vm2, %v429_v41, %v431_v40  ;;  %vm438_vm5 = vcmp.eq.s32.totalorder %v402_v52, 0 }
 0x1a0   :  { %vm456_vm6 = vcmp.lt.s32.totalorder %v400_v44, 127  ;;  %vm439_vm7 = vcmp.eq.s32.totalorder %v403_v55, 0  ;;  %vm450_vm8 = vcmp.eq.s32.totalorder %v402_v52, 15  ;;  %vm451_vm9 = vcmp.eq.s32.totalorder %v403_v55, 15 }
 0x1a2   :  { %v575_v58 = vpop.eup %574 }
 0x1a3   :  { %v577_v60 = vpop.eup %576  ;;  %v354_v2 = vmul.f32 %v575_v58, %v337_v59  ;;  %v446_v58 = vsel %vm444_vm3, %v443_v48, %v441_v49 }
 0x1a4   :  { %v579_v61 = vpop.eup %578  ;;  %v358_v7 = vmul.f32 %v577_v60, %v347_v5  ;;  %v421_v60 = vsel %vm404_vm1, %v418_v32, %v420_v31  ;;  %v395_v31 = vstv %s516_s10 }
 0x1a5   :  { %v581_v63 = vpop.eup %580  ;;  %v355_v6 = vmul.f32 %v579_v61, %v337_v59  ;;  %v447_v59 = vstv %s763_s28  ;;  %v437_v61 = vsel %vm427_vm4, %v435_v54, %v434_v53 }
 0x1a6   :  { %v583_v0 = vpop.eup %582  ;;  %v359_v14 = vmul.f32 %v581_v63, %v347_v5  ;;  %v453_v63 = vpop.permute.xlu0 %452 }
 0x1a7   :  { %v585_v1 = vpop.eup %584  ;;  %v356_v3 = vmul.f32 %v583_v0, %v342_v62  ;;  %v462_v0 = vadd.f32 %v433_v57, %v424_v56 }
 0x1a8   :  { %v587_v4 = vpop.eup %586  ;;  %v360_v15 = vmul.f32 %v585_v1, %v352_v13  ;;  %v445_v1 = vsel %vm444_vm3, %v441_v49, %v443_v48 }
 0x1a9   :  { %v362_v8 = vadd.f32 %v356_v3, %v354_v2  ;;  %v357_v9 = vmul.f32 %v587_v4, %v342_v62  ;;  %v589_v12 = vpop.eup %588  ;;  %v455_v62 = vpop.permute.xlu1 %454  ;;  %v448_v2 = vsel %vm438_vm5, %v447_v59, %v446_v58  ;;  %v463_v4 = vadd.f32 %v437_v61, %v421_v60 }
 0x1aa   :  { %v361_v22 = vmul.f32 %v589_v12, %v352_v13  ;;  %v457_v5 = vsel %vm456_vm6, %v453_v63, %v455_v62  ;;  %v464_v12 = vadd.f32 %v462_v0, %v448_v2  ;;  %v458_v13 = vsel %vm456_vm6, %v455_v62, %v453_v63 }
 0x1ab   :  { %v363_v17 = vadd.f32 %v362_v8, %v358_v7  ;;  %v371_v18 = vadd.f32 %v357_v9, %v355_v6  ;;  %v459_v6 = vstv %s766_s29  ;;  %v449_v8 = vsel %vm439_vm7, %v447_v59, %v445_v1 }
 0x1ad   :  { %v364_v21 = vadd.f32 %v363_v17, %v360_v15  ;;  %v372_v23 = vadd.f32 %v371_v18, %v359_v14  ;;  %v471_v14 = vstv %s768_s30  ;;  %v460_v17 = vsel %vm450_vm8, %v459_v6, %v457_v5 }
 0x1ae   :  { %v465_v18 = vadd.f32 %v463_v4, %v449_v8 }
 0x1af   :  { %v365_v25 = vrot.slane %v364_v21, 4  ;;  %v373_v26 = vadd.f32 %v372_v23, %v361_v22  ;;  %v472_v22 = vmul.f32 %v471_v14, %v719_v19  ;;  %v466_v23 = vadd.f32 %v464_v12, %v460_v17 }
 0x1b1   :  { %v366_v27 = vadd.f32 %v365_v25, %v364_v21  ;;  %v374_v28 = vrot.slane %v373_v26, 4  ;;  %v461_v21 = vsel %vm451_vm9, %v459_v6, %v458_v13  ;;  %v468_v25 = vstv %s517_s9 }
 0x1b3   :  { %v367_v29 = vrot.slane %v366_v27, 2  ;;  %v375_v30 = vadd.f32 %v374_v28, %v373_v26  ;;  %v467_v26 = vadd.f32 %v465_v18, %v461_v21 }
 0x1b5   :  { %v368_v33 = vadd.f32 %v367_v29, %v366_v27  ;;  %v376_v34 = vrot.slane %v375_v30, 2  ;;  %v620_v27 = vmov 1966171168   ;;  %v469_v29 = vmul.f32 %v468_v25, %v466_v23 }
 0x1b6   :  { %v492_v28 = vunpack.c.l.s4 %v620_v27  ;;  %v470_v32 = vmul.f32 %v468_v25, %v467_v26 }
 0x1b7   :  { %v369_v35 = vrot.slane %v368_v33, 1  ;;  %v377_v36 = vadd.f32 %v376_v34, %v375_v30  ;;  %v477_v30 = vrot.slane %v472_v22, %v722_v20 }
 0x1b9   :  { %v370_v38 = vadd.f32 %v369_v35, %v368_v33  ;;  %v378_v39 = vrot.slane %v377_v36, 1  ;;  %v481_v33 = vrot.slane %v472_v22, %v733_v24  ;;  %v493_v35 = vunpack.c.0.s8 %v492_v28 }
 0x1bb   :  { %v381_v42 = vadd.f32 %v380_v37, %v370_v38  ;;  %v379_v43 = vadd.f32 %v378_v39, %v377_v36  ;;  %v485_v40 = vadd.f32 %v481_v33, %v470_v32  ;;  %v496_v41 = vsub.s32 %v493_v35, %v708_v16 }
 0x1bd   :  { %v527_v45 = vmul.f32 -1.442695, %v381_v42  ;;  %v382_v46 = vadd.f32 %v380_v37, %v379_v43  ;;  %v484_v37 = vadd.f32 %v477_v30, %v469_v29 }
 0x1bf   :  { %590 = vpow2.f32 %v527_v45  ;;  %v528_v47 = vmul.f32 -1.442695, %v382_v46 }
 0x1c1   :  { %592 = vpow2.f32 %v528_v47 }
 0x1c9   :  { %v591_v3 = vpop.eup %590 }
 0x1ca   :  { %v389_v7 = vadd.f32 1.0, %v591_v3 }
 0x1cb   :  { %v593_v9 = vpop.eup %592 }
 0x1cc   :  { %594 = vrcp.f32 %v389_v7  ;;  %v390_v15 = vadd.f32 1.0, %v593_v9 }
 0x1ce   :  { %596 = vrcp.f32 %v390_v15 }
 0x1d6   :  { %v595_v34 = vpop.eup %594 }
 0x1d7   :  { %v396_v36 = vmul.f32 %v595_v34, %v395_v31 }
 0x1d8   :  { %v597_v38 = vpop.eup %596 }
 0x1d9   :  { %v397_v39 = vmul.f32 %v597_v38, %v395_v31  ;;  %v486_v19 = vmul.f32 %v484_v37, %v396_v36 }
 0x1db   :  { %v487_v42 = vmul.f32 %v485_v40, %v397_v39 }
 0x1dd   :  { %v490_v43 = vcombine.low %v486_v19, %v487_v42 }
 0x1df   :  { %v497_v44 = vrot.slane %v490_v43, %v496_v41 }
 0x1e1   :  { %v504_v20 = vrot.slane %v497_v44, %v496_v41 }
 0x1e3   :  { %510 = vst.msk [vmem:[%s795_s8] sm:$0x3] %vm508_vm10, %v504_v20 }
 0x1e4   :  { %515 = vsyncpa [#allocation3], 1 }

</bundles_post_ra>
